<compile_context>
chip_gen: v7x
topology: tpu7x:2x2x1
jax: 0.10.0
libtpu: 0.0.40
codegen_flags: <defaults>
</compile_context>

<pallas_src>
import jax
import jax.numpy as jnp
from jax.experimental import pallas as pl
from jax.experimental.pallas import tpu as pltpu


def gmf_kernel(vt_ref, ht_ref, vidx_ref, hidx_ref, out_ref):
    # vt_ref : (Da, Nv) f32  augmented virus table  rows = [emb.T ; bias ; 1]
    # ht_ref : (Da, Nh) f32  augmented human table  rows = [emb.T ; 1 ; bias]
    # vidx_ref, hidx_ref : (1, TILE_B) int32 indices for this batch tile
    # out_ref : (1, TILE_B) f32 sigmoid(logit), lane-dense
    nv = vt_ref.shape[1]
    nh = ht_ref.shape[1]
    tb = out_ref.shape[1]

    v_idx = vidx_ref[...]                                         # (1, TILE_B)
    h_idx = hidx_ref[...]                                         # (1, TILE_B)

    # One-hot gather on the MXU: table_T (Da, N) @ one_hot (N, TILE_B).
    oh_v = (jax.lax.broadcasted_iota(jnp.int32, (nv, tb), 0) == v_idx
            ).astype(jnp.float32)                                 # (Nv, TILE_B)
    oh_h = (jax.lax.broadcasted_iota(jnp.int32, (nh, tb), 0) == h_idx
            ).astype(jnp.float32)                                 # (Nh, TILE_B)

    u = jnp.dot(vt_ref[...], oh_v,
                preferred_element_type=jnp.float32,
                precision=jax.lax.Precision.HIGHEST)              # (Da, TILE_B)
    v = jnp.dot(ht_ref[...], oh_h,
                preferred_element_type=jnp.float32,
                precision=jax.lax.Precision.HIGHEST)              # (Da, TILE_B)

    # Augmented feature-axis reduce == sum(U*V) + virus_bias + human_bias.
    logit = jnp.sum(u * v, axis=0, keepdims=True)                 # (1, TILE_B) sublane reduce
    out_ref[...] = jax.nn.sigmoid(logit)                          # EUP, unmasked lane-dense store


def gmf_forward(v_idxs, h_idxs, virus_emb, human_emb, virus_b, human_b,
                tile_b=2048):
    B = v_idxs.shape[0]
    D = virus_emb.shape[1]
    Nv = virus_emb.shape[0]
    Nh = human_emb.shape[0]
    Da = D + 2

    # Lane-dense batch tiles: multiple of 128, but never pad a tiny batch out
    # to the full default tile.
    tile_b = max(128, min(int(tile_b), pl.cdiv(B, 128) * 128))
    tile_b = (tile_b // 128) * 128
    num_tiles = pl.cdiv(B, tile_b)
    B_pad = num_tiles * tile_b

    # Pad indices with 0 (always valid); padded lanes are sliced off at the end.
    v_p = jnp.pad(v_idxs.astype(jnp.int32), (0, B_pad - B)).reshape(1, B_pad)
    h_p = jnp.pad(h_idxs.astype(jnp.int32), (0, B_pad - B)).reshape(1, B_pad)

    # Feature-major augmented tables (stay resident in VMEM inside the kernel):
    #   virus rows: [emb.T ; bias ; ones],  human rows: [emb.T ; ones ; bias]
    # so that the single augmented reduce yields sum(U*V) + b_v + b_h.
    vt = jnp.concatenate(
        [virus_emb.T.astype(jnp.float32),
         virus_b.reshape(1, Nv).astype(jnp.float32),
         jnp.ones((1, Nv), jnp.float32)], axis=0)                 # (Da, Nv)
    ht = jnp.concatenate(
        [human_emb.T.astype(jnp.float32),
         jnp.ones((1, Nh), jnp.float32),
         human_b.reshape(1, Nh).astype(jnp.float32)], axis=0)     # (Da, Nh)

    grid_spec = pltpu.PrefetchScalarGridSpec(
        num_scalar_prefetch=0,
        grid=(num_tiles,),
        in_specs=[
            # Constant block index -> tables are fetched once and stay in VMEM.
            pl.BlockSpec((Da, Nv), lambda i: (0, 0)),      # virus table
            pl.BlockSpec((Da, Nh), lambda i: (0, 0)),      # human table
            pl.BlockSpec((1, tile_b), lambda i: (0, i)),   # virus index tile
            pl.BlockSpec((1, tile_b), lambda i: (0, i)),   # human index tile
        ],
        out_specs=pl.BlockSpec((1, tile_b), lambda i: (0, i)),
    )

    out = pl.pallas_call(
        gmf_kernel,
        out_shape=jax.ShapeDtypeStruct((1, B_pad), jnp.float32),
        grid_spec=grid_spec,
        compiler_params=pltpu.CompilerParams(
            # Independent batch tiles -> shard across TensorCores (v7x megacore).
            dimension_semantics=("parallel",),
        ),
    )(vt, ht, v_p, h_p)

    return out[0, :B]  # (B,)


def xavier_normal(key, shape):
    fan_out, fan_in = shape  # nn.Embedding weight: (num_embeddings, dim)
    std = jnp.sqrt(2.0 / (fan_in + fan_out))
    return std * jax.random.normal(key, shape, dtype=jnp.float32)


if __name__ == "__main__":
    # small, deterministic config (sparse=False path of the module)
    config = dict(num_virus=16, num_human=24, latent_dim=32, sparse=False)
    B = 8

    key = jax.random.PRNGKey(0)
    k1, k2, k3, k4, k5, k6 = jax.random.split(key, 6)

    virus_emb = xavier_normal(k1, (config["num_virus"], config["latent_dim"]))
    human_emb = xavier_normal(k2, (config["num_human"], config["latent_dim"]))
    virus_b = xavier_normal(k3, (config["num_virus"], 1))
    human_b = xavier_normal(k4, (config["num_human"], 1))

    v_idxs = jax.random.randint(k5, (B,), 0, config["num_virus"], dtype=jnp.int32)
    h_idxs = jax.random.randint(k6, (B,), 0, config["num_human"], dtype=jnp.int32)

    out = gmf_forward(v_idxs, h_idxs, virus_emb, human_emb, virus_b, human_b)
    out = jax.block_until_ready(out)

    # pure-JAX reference check
    U = virus_emb[v_idxs]
    V = human_emb[h_idxs]
    ref = jax.nn.sigmoid((U * V).sum(1) + virus_b[v_idxs, 0] + human_b[h_idxs, 0])
    assert out.shape == (B,)
    assert jnp.allclose(out, ref, atol=1e-5, rtol=1e-5), (out, ref)

    print("KERNEL_OK")
</pallas_src>

<mosaic_0001>
module attributes {stable_mosaic.version = 11 : i64} {
  func.func @gmf_kernel(%arg0: i32, %arg1: memref<34x16xf32, #tpu.memory_space<vmem>>, %arg2: memref<34x24xf32, #tpu.memory_space<vmem>>, %arg3: memref<1x128xi32, #tpu.memory_space<vmem>>, %arg4: memref<1x128xi32, #tpu.memory_space<vmem>>, %arg5: memref<1x128xf32, #tpu.memory_space<vmem>>) attributes {dimension_semantics = [#tpu.dimension_semantics<parallel>], iteration_bounds = array<i64: 1>, scalar_prefetch = 0 : i64, scratch_operands = 0 : i64, tpu.core_type = #tpu.core_type<tc>, window_params = [{pipeline_mode = #tpu.pipeline_mode<synchronous>, transform_indices = @transform_0, window_bounds = array<i64: 34, 16>}, {pipeline_mode = #tpu.pipeline_mode<synchronous>, transform_indices = @transform_1, window_bounds = array<i64: 34, 24>}, {transform_indices = @transform_2, window_bounds = array<i64: 1, 128>}, {transform_indices = @transform_3, window_bounds = array<i64: 1, 128>}, {transform_indices = @transform_4, window_bounds = array<i64: 1, 128>}]} {
    %c0 = arith.constant 0 : index
    %c0_0 = arith.constant 0 : index
    %0 = vector.load %arg3[%c0, %c0_0] : memref<1x128xi32, #tpu.memory_space<vmem>>, vector<1x128xi32>
    %c0_1 = arith.constant 0 : index
    %c0_2 = arith.constant 0 : index
    %1 = vector.load %arg4[%c0_1, %c0_2] : memref<1x128xi32, #tpu.memory_space<vmem>>, vector<1x128xi32>
    %2 = tpu.iota {dimensions = array<i32: 0>} : vector<16x128xi32>
    %3 = vector.broadcast %0 : vector<1x128xi32> to vector<16x128xi32>
    %4 = arith.cmpi eq, %2, %3 : vector<16x128xi32>
    %5 = arith.extui %4 : vector<16x128xi1> to vector<16x128xi32>
    %6 = arith.sitofp %5 : vector<16x128xi32> to vector<16x128xf32>
    %7 = tpu.iota {dimensions = array<i32: 0>} : vector<24x128xi32>
    %8 = vector.broadcast %1 : vector<1x128xi32> to vector<24x128xi32>
    %9 = arith.cmpi eq, %7, %8 : vector<24x128xi32>
    %10 = arith.extui %9 : vector<24x128xi1> to vector<24x128xi32>
    %11 = arith.sitofp %10 : vector<24x128xi32> to vector<24x128xf32>
    %c0_3 = arith.constant 0 : index
    %c0_4 = arith.constant 0 : index
    %12 = vector.load %arg1[%c0_3, %c0_4] : memref<34x16xf32, #tpu.memory_space<vmem>>, vector<34x16xf32>
    %cst = arith.constant dense<0.000000e+00> : vector<34x128xf32>
    %13 = tpu.matmul %12, %6, %cst {dimension_numbers = #tpu.dot_dimension_numbers<[1], [0], [0], [1], [0, 0, 1, 1], [], []>, precision = #tpu.contract_precision<fp32>} : vector<34x16xf32>, vector<16x128xf32>, vector<34x128xf32> -> vector<34x128xf32>
    %c0_5 = arith.constant 0 : index
    %c0_6 = arith.constant 0 : index
    %14 = vector.load %arg2[%c0_5, %c0_6] : memref<34x24xf32, #tpu.memory_space<vmem>>, vector<34x24xf32>
    %cst_7 = arith.constant dense<0.000000e+00> : vector<34x128xf32>
    %15 = tpu.matmul %14, %11, %cst_7 {dimension_numbers = #tpu.dot_dimension_numbers<[1], [0], [0], [1], [0, 0, 1, 1], [], []>, precision = #tpu.contract_precision<fp32>} : vector<34x24xf32>, vector<24x128xf32>, vector<34x128xf32> -> vector<34x128xf32>
    %16 = arith.mulf %13, %15 : vector<34x128xf32>
    %cst_8 = arith.constant dense<0.000000e+00> : vector<128xf32>
    %17 = vector.multi_reduction <add>, %16, %cst_8 [0] : vector<34x128xf32> to vector<128xf32>
    %18 = vector.shape_cast %17 : vector<128xf32> to vector<1x128xf32>
    %19 = arith.negf %18 : vector<1x128xf32>
    %20 = math.exp %19 : vector<1x128xf32>
    %cst_9 = arith.constant 1.000000e+00 : f32
    %21 = vector.broadcast %cst_9 : f32 to vector<1x128xf32>
    %22 = arith.addf %21, %20 : vector<1x128xf32>
    %23 = arith.divf %21, %22 : vector<1x128xf32>
    %c0_10 = arith.constant 0 : index
    %c0_11 = arith.constant 0 : index
    %24 = vector.load %arg5[%c0_10, %c0_11] : memref<1x128xf32, #tpu.memory_space<vmem>>, vector<1x128xf32>
    tpu.vector_store %arg5[%c0_10, %c0_11], %23 {strides = array<i32>} : memref<1x128xf32, #tpu.memory_space<vmem>>, vector<1x128xf32>,
    return
  }
  func.func @transform_0(%arg0: i32) -> (i32, i32) {
    %c0_i32 = arith.constant 0 : i32
    %c0_i32_0 = arith.constant 0 : i32
    %c0_i32_1 = arith.constant 0 : i32
    return %c0_i32, %c0_i32_0 : i32, i32
  }
  func.func @transform_1(%arg0: i32) -> (i32, i32) {
    %c0_i32 = arith.constant 0 : i32
    %c0_i32_0 = arith.constant 0 : i32
    %c0_i32_1 = arith.constant 0 : i32
    return %c0_i32, %c0_i32_0 : i32, i32
  }
  func.func @transform_2(%arg0: i32) -> (i32, i32) {
    %c0_i32 = arith.constant 0 : i32
    %c0_i32_0 = arith.constant 0 : i32
    return %c0_i32, %arg0 : i32, i32
  }
  func.func @transform_3(%arg0: i32) -> (i32, i32) {
    %c0_i32 = arith.constant 0 : i32
    %c0_i32_0 = arith.constant 0 : i32
    return %c0_i32, %arg0 : i32, i32
  }
  func.func @transform_4(%arg0: i32) -> (i32, i32) {
    %c0_i32 = arith.constant 0 : i32
    %c0_i32_0 = arith.constant 0 : i32
    return %c0_i32, %arg0 : i32, i32
  }
}

</mosaic_0001>

<bundles_post_ra>
// kernel: tpu_custom_call.1
= control target key start
LH: loop header
LB: loop body
LE: loop exit
PB: predicated region body
PF: predicated region fallthrough
CT: control target
= control target key end

     0   :  { %v20_v1 = vlaneseq  ;;  %v1925_v2 = vmov 0.0|0.0   ;;  %vm52_vm0 = vcmask 130048   ;;  %vm1926_vm1 = vmmov 0   ;;  %s2413_s0 = inlined_call_operand.vmem [shape: f32[34,16], index: 0, kind: input, shape index: {}]   ;;  %s2414_s1 = inlined_call_operand.vmem [shape: f32[34,24], index: 1, kind: input, shape index: {}]   ;;  %s2415_s2 = inlined_call_operand.vmem [shape: s32[1,128], index: 2, kind: input, shape index: {}]   ;;  %s2416_s3 = inlined_call_operand.vmem [shape: s32[1,128], index: 3, kind: input, shape index: {}]   ;;  %s2417_s4 = inlined_call_operand.hbm [shape: f32[1,128], index: 4, kind: output, shape index: {}]  }
   0x1   :  { %v1959_v0 = vld [vmem:[%s2416_s3] ss:$0 sm:$0xff]  ;;  %1773 = vmatprep.subr.bf16.mxu1 %v1925_v2  ;;  %1755 = vmatprep.subr.bf16.mxu0 %v1925_v2  ;;  %v1927_v6 = vmov 0.0   ;;  %vm704_vm2 = vcmask 195584   ;;  %v48_v9 = vld [vmem:[%s2413_s0 + $0x8] sm:$0xff] }
   0x2   :  { %v1402_v3 = vld [vmem:[%s2415_s2] ss:$0 sm:$0xff]  ;;  %v21_v5 = vshrl.u32 %v20_v1, 7  ;;  %1519 = vmatprep.mubr.msk.f32.mxu0 %vm1926_vm1, %v1927_v6  ;;  %1635 = vmatprep.mubr.msk.f32.mxu1 %vm1926_vm1, %v1927_v6  ;;  %v700_v10 = vld [vmem:[%s2414_s1 + $0x8] sm:$0xff]  ;;  %v57_v13 = vsel %vm52_vm0, %v48_v9, 0 }
   0x3   :  { %v47_v4 = vld [vmem:[%s2413_s0] sm:$0xff]  ;;  %v1988_v14 = vsel %vm704_vm2, %v700_v10, 0 }
   0x4   :  { %v54_v7 = vsel %vm52_vm0, %v47_v4, 0  ;;  %v699_v8 = vld [vmem:[%s2414_s1] sm:$0xff]  ;;  %v22_v15 = vadd.s32 8, %v21_v5  ;;  %vm38_vm3 = vcmp.eq.s32.totalorder %v21_v5, %v1959_v0  ;;  %vm27_vm4 = vcmp.eq.s32.totalorder %v21_v5, %v1402_v3 }
   0x5   :  { %v1983_v11 = vand.u32 4294901760, %v54_v7  ;;  %v706_v12 = vsel %vm704_vm2, %v699_v8, 0  ;;  %v1991_v16 = vadd.s32 16, %v21_v5  ;;  %v1406_v17 = vsel %vm38_vm3, 1.0, %v1927_v6 }
   0x6   :  { %v1403_v18 = vsel %vm27_vm4, 1.0, %v1927_v6  ;;  %v1999_v20 = vand.u32 4294901760, %v706_v12  ;;  %vm39_vm5 = vcmp.eq.s32.totalorder %v22_v15, %v1959_v0  ;;  %v2002_v21 = vsub.f32 %v1406_v17, %v1406_v17 }
   0x7   :  { %v1997_v19 = vsub.f32 %v54_v7, %v1983_v11  ;;  %vm28_vm6 = vcmp.eq.s32.totalorder %v22_v15, %v1402_v3  ;;  %v2004_v22 = vsub.f32 %v1403_v18, %v1403_v18 }
   0x8   :  { %9 = vsyncpa [#allocation3], 0  ;;  %v1407_v23 = vsel %vm39_vm5, 1.0, %v1927_v6  ;;  %v1404_v25 = vsel %vm28_vm6, 1.0, %v1927_v6  ;;  %vm40_vm8 = vcmp.eq.s32.totalorder %v1991_v16, %v1959_v0  ;;  %v1928_v27 = vmov 1.0|1.0  }
   0x9   :  { %vm2007_vm7 = vmpackc.low %vm39_vm5, %vm38_vm3  ;;  %v137_v26 = vand.u32 4294901760, %v1997_v19  ;;  %v841_v28 = vand.u32 4294901760, %v2002_v21  ;;  %v2019_v29 = vsub.f32 %v1407_v23, %v1407_v23  ;;  %v188_v31 = vand.u32 4294901760, %v2004_v22  ;;  %v49_v41 = vld [vmem:[%s2413_s0 + $0x10] sm:$0xff]  ;;  %v50_v56 = vld [vmem:[%s2413_s0 + $0x18] sm:$0xff] }
   0xa   :  { %1775 = vmatpush3.bf16.msk.msra.mxu1 %vm2007_vm7, %v1928_v27  ;;  %vm2022_vm9 = vmpackc.low %vm28_vm6, %vm27_vm4  ;;  %v2027_v32 = vsub.f32 %v1404_v25, %v1404_v25  ;;  %v1408_v34 = vsel %vm40_vm8, 1.0, %v1927_v6  ;;  %v2041_v35 = vsub.f32 %v706_v12, %v1999_v20  ;;  %v2043_v36 = vand.u32 4294901760, %v57_v13  ;;  %v701_v46 = vld [vmem:[%s2414_s1 + $0x10] sm:$0xff]  ;;  %v702_v3 = vld [vmem:[%s2414_s1 + $0x18] sm:$0xff] }
   0xb   :  { %1757 = vmatpush3.bf16.msk.msra.mxu0 %vm2022_vm9, %v1928_v27  ;;  %1633 = vmatprep.subr.mxu1 %v1927_v6  ;;  %v138_v33 = vsub.f32 %v1997_v19, %v137_v26  ;;  %v842_v37 = vsub.f32 %v2002_v21, %v841_v28  ;;  %v848_v38 = vand.u32 4294901760, %v2019_v29  ;;  %v189_v39 = vsub.f32 %v2004_v22, %v188_v31  ;;  %v51_v4 = vld [vmem:[%s2413_s0 + $0x20] sm:$0x3]  ;;  %s1930_s0 = smov [#allocation2]  }
   0xc   :  { %v195_v40 = vand.u32 4294901760, %v2027_v32  ;;  %1758 = vmatprep.subr.bf16.mxu0 %v1925_v2  ;;  %v2057_v43 = vsub.f32 %v1408_v34, %v1408_v34  ;;  %v790_v44 = vand.u32 4294901760, %v2041_v35  ;;  %v2061_v45 = vsub.f32 %v57_v13, %v2043_v36  ;;  %v703_v15 = vld [vmem:[%s2414_s1 + $0x20] sm:$0x3]  ;;  %s1394_s1 = sshll.u32 %s1930_s0, 4  ;;  %s1395_s1 = int_to_ptr.vmem [resolvable:$true] %s1394_s1 }
   0xd   :  { %v139_v42 = vand.u32 4294901760, %v138_v33  ;;  %v843_v47 = vand.u32 4294901760, %v842_v37  ;;  %v849_v48 = vsub.f32 %v2019_v29, %v848_v38  ;;  %v190_v49 = vand.u32 4294901760, %v189_v39  ;;  %s1901_s11 = scalar_lea.vmem %s1395_s1, 16  ;;  %s1905_s12 = scalar_lea.vmem %s1395_s1, 32 }
   0xe   :  { %v196_v50 = vsub.f32 %v2027_v32, %v195_v40  ;;  %v1929_v51 = vmov 1.0   ;;  %v791_v52 = vsub.f32 %v2041_v35, %v790_v44  ;;  %v147_v53 = vand.u32 4294901760, %v2061_v45  ;;  %p1902_p0 = scmp.ne.s32.totalorder %s1395_s1, %s1901_s11  ;;  %p1906_p1 = scmp.lt.s32.totalorder %s1395_s1, %s1395_s1 }
   0xf   :  { %1634 = vmatpush3.msk.msra.mxu1 %vm40_vm8, %v1929_v51  ;;  %1520 = vmatmul.mubr.f32.vlgmr.msra.gmra.mrb[0].mxu0 %v139_v42  ;;  %v2081_v54 = vand.u32 4294901760, %v1988_v14  ;;  %v60_v55 = vsel %vm52_vm0, %v49_v41, 0  ;;  %v850_v57 = vand.u32 4294901760, %v849_v48  ;;  %v712_v60 = vsel %vm704_vm2, %v701_v46, 0  ;;  %p1907_p2 = scmp.lt.s32.totalorder %s1905_s12, %s1901_s11 }
  0x10   :  { %1776 = vmatprep.subr.bf16.mxu1 %v1925_v2  ;;  %v197_v58 = vand.u32 4294901760, %v196_v50  ;;  %1522 = vmatprep.mubr.msk.f32.mxu0 %vm1926_vm1, %v1927_v6  ;;  %v2090_v59 = vand.u32 4294901760, %v60_v55  ;;  %v792_v61 = vand.u32 4294901760, %v791_v52  ;;  %v148_v62 = vsub.f32 %v2061_v45, %v147_v53 }
  0x11   :  { %v2098_v63 = vsub.f32 %v1988_v14, %v2081_v54  ;;  %v2100_v1 = vand.u32 4294901760, %v712_v60  ;;  %v1777_v7 = vpack.c.bf16 %v850_v57, %v843_v47  ;;  %v63_v9 = vsel %vm52_vm0, %v50_v56, 0  ;;  %p1908_p3 = por %p1907_p2, %p1906_p1 }
  0x12   :  { %v1759_v5 = vpack.c.bf16 %v197_v58, %v190_v49  ;;  %v2109_v8 = vsub.f32 %v60_v55, %v2090_v59  ;;  %1636 = vmatmul.mubr.f32.vlgmr.msra.gmra.mrb[0].mxu1 %v792_v61  ;;  %v149_v10 = vand.u32 4294901760, %v148_v62  ;;  %v2116_v14 = vand.u32 4294901760, %v63_v9 }
  0x13   :  { %v800_v12 = vand.u32 4294901760, %v2098_v63  ;;  %v2114_v13 = vsub.f32 %v712_v60, %v2100_v1  ;;  %1638 = vmatprep.mubr.msk.f32.mxu1 %vm1926_vm1, %v1927_v6  ;;  %v715_v18 = vsel %vm704_vm2, %v702_v3, 0  ;;  %v66_v23 = vsel %vm52_vm0, %v51_v4, 0  ;;  %1778 = vmatpush3.bf16.msra.mxu1 %v1777_v7  ;;  %p1909_p4 = pnand %p1908_p3, %p1902_p0 }
  0x14   :  { %1760 = vmatpush3.bf16.msra.mxu0 %v1759_v5  ;;  %v157_v17 = vand.u32 4294901760, %v2109_v8  ;;  %v855_v25 = vand.u32 4294901760, %v2057_v43  ;;  %v2132_v37 = vsub.f32 %v63_v9, %v2116_v14  ;;  %v2134_v39 = vand.u32 4294901760, %v715_v18  ;;  %1654 = vmatprep.subr.mxu1 %v1927_v6 }
  0x15   :  { %1523 = vmatmul.mubr.f32.gmra.mrb[2].mxu0 %v149_v10  ;;  %v801_v33 = vsub.f32 %v2098_v63, %v800_v12  ;;  %v810_v34 = vand.u32 4294901760, %v2114_v13  ;;  %v2142_v42 = vand.u32 4294901760, %v66_v23  ;;  %v718_v47 = vsel %vm704_vm2, %v703_v15, 0  ;;  %1761 = vmatprep.subr.bf16.mxu0 %v1925_v2 }
  0x16   :  { %1525 = vmatprep.mubr.msk.f32.mxu0 %vm1926_vm1, %v1927_v6  ;;  %v158_v41 = vsub.f32 %v2109_v8, %v157_v17  ;;  %v856_v46 = vsub.f32 %v2057_v43, %v855_v25  ;;  %v167_v50 = vand.u32 4294901760, %v2132_v37  ;;  %v2153_v52 = vsub.f32 %v715_v18, %v2134_v39 }
  0x17   :  { %v802_v48 = vand.u32 4294901760, %v801_v33  ;;  %v811_v49 = vsub.f32 %v2114_v13, %v810_v34  ;;  %v2157_v56 = vsub.f32 %v66_v23, %v2142_v42  ;;  %v2159_v58 = vand.u32 4294901760, %v718_v47 }
  0x18   :  { %v159_v55 = vand.u32 4294901760, %v158_v41  ;;  %v857_v57 = vand.u32 4294901760, %v856_v46  ;;  %v168_v61 = vsub.f32 %v2132_v37, %v167_v50  ;;  %v820_v62 = vand.u32 4294901760, %v2153_v52 }
  0x19   :  { %1639 = vmatmul.mubr.f32.gmra.mrb[2].mxu1 %v802_v48  ;;  %v812_v60 = vand.u32 4294901760, %v811_v49  ;;  %v177_v3 = vand.u32 4294901760, %v2157_v56  ;;  %v2169_v4 = vsub.f32 %v718_v47, %v2159_v58  ;;  %v2175_v5 = vpack.c.bf16 %v195_v40, %v188_v31 }
  0x1a   :  { %1526 = vmatmul.mubr.f32.gmra.mrb[4].mxu0 %v159_v55  ;;  %1641 = vmatprep.mubr.msk.f32.mxu1 %vm1926_vm1, %v1927_v6  ;;  %v169_v7 = vand.u32 4294901760, %v168_v61  ;;  %v821_v9 = vsub.f32 %v2153_v52, %v820_v62  ;;  %v2186_v10 = vpack.c.bf16 %v848_v38, %v841_v28  ;;  %v1762_v23 = vpack.c.bf16 %v2027_v32, %v2004_v22 }
  0x1b   :  { %1528 = vmatprep.mubr.msk.f32.mxu0 %vm1926_vm1, %v1927_v6  ;;  %1655 = vmatpush3.msra.mxu1 %v857_v57  ;;  %v178_v31 = vsub.f32 %v2157_v56, %v177_v3  ;;  %v830_v40 = vand.u32 4294901760, %v2169_v4  ;;  %v1780_v33 = vpack.c.bf16 %v2019_v29, %v2002_v21  ;;  %vm1372_vm10 = vcmask 1041408  }
  0x1c   :  { %1779 = vmatprep.subr.bf16.mxu1 %v1925_v2  ;;  %v822_v15 = vand.u32 4294901760, %v821_v9 }
  0x1d   :  { %1642 = vmatmul.mubr.f32.gmra.mrb[4].mxu1 %v812_v60  ;;  %v179_v18 = vand.u32 4294901760, %v178_v31  ;;  %v831_v28 = vsub.f32 %v2169_v4, %v830_v40 }
  0x1e   :  { %1529 = vmatmul.mubr.f32.gmra.mrb[6].mxu0 %v169_v7  ;;  %1644 = vmatprep.mubr.msk.f32.mxu1 %vm1926_vm1, %v1927_v6 }
  0x1f   :  { %1531 = vmatprep.mubr.msk.f32.mxu0 %vm1926_vm1, %v1927_v6  ;;  %v832_v38 = vand.u32 4294901760, %v831_v28 }
  0x21   :  { %1645 = vmatmul.mubr.f32.gmra.mrb[6].mxu1 %v822_v15 }
  0x22   :  { %1532 = vmatmul.mubr.f32.gmra.mrb[8].mxu0 %v179_v18  ;;  %1647 = vmatprep.mubr.msk.f32.mxu1 %vm1926_vm1, %v1927_v6 }
  0x23   :  { %1538 = vmatprep.mubr.msk.f32.mxu0 %vm1926_vm1, %v1927_v6 }
  0x25   :  { %1648 = vmatmul.mubr.f32.gmra.mrb[8].mxu1 %v832_v38 }
  0x26   :  { %1539 = vmatmul.mubr.f32.vlgmr.msra.gmra.mrb[0].mxu0 %v1983_v11  ;;  %1656 = vmatprep.mubr.msk.f32.mxu1 %vm1926_vm1, %v1927_v6 }
  0x27   :  { %1541 = vmatprep.mubr.msk.f32.mxu0 %vm1926_vm1, %v1927_v6  ;;  %1763 = vmatpush3.bf16.msra.mxu0 %v1762_v23 }
  0x28   :  { %1764 = vmatprep.subr.bf16.mxu0 %v1925_v2 }
  0x29   :  { %1657 = vmatmul.mubr.f32.vlgmr.msra.gmra.mrb[0].mxu1 %v1999_v20 }
  0x2a   :  { %1542 = vmatmul.mubr.f32.gmra.mrb[2].mxu0 %v2043_v36  ;;  %1659 = vmatprep.mubr.msk.f32.mxu1 %vm1926_vm1, %v1927_v6 }
  0x2b   :  { %1781 = vmatpush3.bf16.msra.mxu1 %v1780_v33  ;;  %1544 = vmatprep.mubr.msk.f32.mxu0 %vm1926_vm1, %v1927_v6 }
  0x2c   :  { %1675 = vmatprep.subr.mxu1 %v1927_v6 }
  0x2d   :  { %1660 = vmatmul.mubr.f32.gmra.mrb[2].mxu1 %v2081_v54 }
  0x2e   :  { %1545 = vmatmul.mubr.f32.gmra.mrb[4].mxu0 %v2090_v59  ;;  %1662 = vmatprep.mubr.msk.f32.mxu1 %vm1926_vm1, %v1927_v6 }
  0x2f   :  { %1547 = vmatprep.mubr.msk.f32.mxu0 %vm1926_vm1, %v1927_v6  ;;  %1676 = vmatpush3.msra.mxu1 %v2057_v43 }
  0x30   :  { %1782 = vmatprep.subr.bf16.mxu1 %v1925_v2 }
  0x31   :  { %1663 = vmatmul.mubr.f32.gmra.mrb[4].mxu1 %v2100_v1 }
  0x32   :  { %1548 = vmatmul.mubr.f32.gmra.mrb[6].mxu0 %v2116_v14  ;;  %1665 = vmatprep.mubr.msk.f32.mxu1 %vm1926_vm1, %v1927_v6 }
  0x33   :  { %1550 = vmatprep.mubr.msk.f32.mxu0 %vm1926_vm1, %v1927_v6 }
  0x35   :  { %1666 = vmatmul.mubr.f32.gmra.mrb[6].mxu1 %v2134_v39 }
  0x36   :  { %1551 = vmatmul.mubr.f32.gmra.mrb[8].mxu0 %v2142_v42  ;;  %1668 = vmatprep.mubr.msk.f32.mxu1 %vm1926_vm1, %v1927_v6 }
  0x37   :  { %1557 = vmatprep.mubr.msk.f32.mxu0 %vm1926_vm1, %v1927_v6 }
  0x39   :  { %1669 = vmatmul.mubr.f32.gmra.mrb[8].mxu1 %v2159_v58 }
  0x3a   :  { %1558 = vmatmul.mubr.f32.vlgmr.msra.gmra.mrb[0].mxu0 %v1997_v19  ;;  %1677 = vmatprep.mubr.msk.f32.mxu1 %vm1926_vm1, %v1927_v6 }
  0x3b   :  { %1560 = vmatprep.mubr.msk.f32.mxu0 %vm1926_vm1, %v1927_v6  ;;  %1766 = vmatpush3.bf16.msk.msra.mxu0 %vm2022_vm9, %v1928_v27 }
  0x3c   :  { %1767 = vmatprep.subr.bf16.mxu0 %v1925_v2 }
  0x3d   :  { %1678 = vmatmul.mubr.f32.vlgmr.msra.gmra.mrb[0].mxu1 %v2041_v35 }
  0x3e   :  { %1561 = vmatmul.mubr.f32.gmra.mrb[2].mxu0 %v2061_v45  ;;  %1680 = vmatprep.mubr.msk.f32.mxu1 %vm1926_vm1, %v1927_v6 }
  0x3f   :  { %1784 = vmatpush3.bf16.msk.msra.mxu1 %vm2007_vm7, %v1928_v27  ;;  %1563 = vmatprep.mubr.msk.f32.mxu0 %vm1926_vm1, %v1927_v6 }
  0x40   :  { %1696 = vmatprep.subr.mxu1 %v1927_v6 }
  0x41   :  { %1681 = vmatmul.mubr.f32.gmra.mrb[2].mxu1 %v2098_v63 }
  0x42   :  { %1564 = vmatmul.mubr.f32.gmra.mrb[4].mxu0 %v2109_v8  ;;  %1683 = vmatprep.mubr.msk.f32.mxu1 %vm1926_vm1, %v1927_v6 }
  0x43   :  { %1566 = vmatprep.mubr.msk.f32.mxu0 %vm1926_vm1, %v1927_v6  ;;  %1697 = vmatpush3.msk.msra.mxu1 %vm40_vm8, %v1929_v51 }
  0x44   :  { %1785 = vmatprep.subr.bf16.mxu1 %v1925_v2 }
  0x45   :  { %1684 = vmatmul.mubr.f32.gmra.mrb[4].mxu1 %v2114_v13 }
  0x46   :  { %1567 = vmatmul.mubr.f32.gmra.mrb[6].mxu0 %v2132_v37  ;;  %1686 = vmatprep.mubr.msk.f32.mxu1 %vm1926_vm1, %v1927_v6 }
  0x47   :  { %1569 = vmatprep.mubr.msk.f32.mxu0 %vm1926_vm1, %v1927_v6 }
  0x49   :  { %1687 = vmatmul.mubr.f32.gmra.mrb[6].mxu1 %v2153_v52 }
  0x4a   :  { %1570 = vmatmul.mubr.f32.gmra.mrb[8].mxu0 %v2157_v56  ;;  %1689 = vmatprep.mubr.msk.f32.mxu1 %vm1926_vm1, %v1927_v6 }
  0x4b   :  { %1576 = vmatprep.mubr.msk.f32.mxu0 %vm1926_vm1, %v1927_v6 }
  0x4d   :  { %1690 = vmatmul.mubr.f32.gmra.mrb[8].mxu1 %v2169_v4 }
  0x4e   :  { %1577 = vmatmul.mubr.f32.vlgmr.msra.gmra.mrb[0].mxu0 %v137_v26  ;;  %1698 = vmatprep.mubr.msk.f32.mxu1 %vm1926_vm1, %v1927_v6 }
  0x4f   :  { %1579 = vmatprep.mubr.msk.f32.mxu0 %vm1926_vm1, %v1927_v6  ;;  %1769 = vmatpush3.bf16.msra.mxu0 %v2175_v5 }
  0x50   :  { %1770 = vmatprep.subr.bf16.mxu0 %v1925_v2 }
  0x51   :  { %1699 = vmatmul.mubr.f32.vlgmr.msra.gmra.mrb[0].mxu1 %v790_v44 }
  0x52   :  { %1580 = vmatmul.mubr.f32.gmra.mrb[2].mxu0 %v147_v53  ;;  %1701 = vmatprep.mubr.msk.f32.mxu1 %vm1926_vm1, %v1927_v6 }
  0x53   :  { %1787 = vmatpush3.bf16.msra.mxu1 %v2186_v10  ;;  %1582 = vmatprep.mubr.msk.f32.mxu0 %vm1926_vm1, %v1927_v6 }
  0x54   :  { %1717 = vmatprep.subr.mxu1 %v1927_v6 }
  0x55   :  { %1702 = vmatmul.mubr.f32.gmra.mrb[2].mxu1 %v800_v12 }
  0x56   :  { %1583 = vmatmul.mubr.f32.gmra.mrb[4].mxu0 %v157_v17  ;;  %1704 = vmatprep.mubr.msk.f32.mxu1 %vm1926_vm1, %v1927_v6 }
  0x57   :  { %1585 = vmatprep.mubr.msk.f32.mxu0 %vm1926_vm1, %v1927_v6  ;;  %1718 = vmatpush3.msra.mxu1 %v855_v25 }
  0x58   :  { %1788 = vmatprep.subr.bf16.mxu1 %v1925_v2 }
  0x59   :  { %1705 = vmatmul.mubr.f32.gmra.mrb[4].mxu1 %v810_v34 }
  0x5a   :  { %1586 = vmatmul.mubr.f32.gmra.mrb[6].mxu0 %v167_v50  ;;  %1707 = vmatprep.mubr.msk.f32.mxu1 %vm1926_vm1, %v1927_v6 }
  0x5b   :  { %1588 = vmatprep.mubr.msk.f32.mxu0 %vm1926_vm1, %v1927_v6 }
  0x5d   :  { %1708 = vmatmul.mubr.f32.gmra.mrb[6].mxu1 %v820_v62 }
  0x5e   :  { %1589 = vmatmul.mubr.f32.gmra.mrb[8].mxu0 %v177_v3  ;;  %1710 = vmatprep.mubr.msk.f32.mxu1 %vm1926_vm1, %v1927_v6 }
  0x5f   :  { %1595 = vmatprep.mubr.msk.f32.mxu0 %vm1926_vm1, %v1927_v6 }
  0x61   :  { %1711 = vmatmul.mubr.f32.gmra.mrb[8].mxu1 %v830_v40 }
  0x62   :  { %1596 = vmatmul.mubr.f32.vlgmr.msra.gmra.mrb[0].mxu0 %v1983_v11  ;;  %1719 = vmatprep.mubr.msk.f32.mxu1 %vm1926_vm1, %v1927_v6 }
  0x63   :  { %1598 = vmatprep.mubr.msk.f32.mxu0 %vm1926_vm1, %v1927_v6  ;;  %1772 = vmatpush3.bf16.msk.msra.mxu0 %vm2022_vm9, %v1928_v27 }
  0x65   :  { %1720 = vmatmul.mubr.f32.vlgmr.msra.gmra.mrb[0].mxu1 %v1999_v20 }
  0x66   :  { %1599 = vmatmul.mubr.f32.gmra.mrb[2].mxu0 %v2043_v36  ;;  %1722 = vmatprep.mubr.msk.f32.mxu1 %vm1926_vm1, %v1927_v6 }
  0x67   :  { %1790 = vmatpush3.bf16.msk.msra.mxu1 %vm2007_vm7, %v1928_v27  ;;  %1601 = vmatprep.mubr.msk.f32.mxu0 %vm1926_vm1, %v1927_v6 }
  0x68   :  { %1738 = vmatprep.subr.mxu1 %v1927_v6 }
  0x69   :  { %1723 = vmatmul.mubr.f32.gmra.mrb[2].mxu1 %v2081_v54 }
  0x6a   :  { %1602 = vmatmul.mubr.f32.gmra.mrb[4].mxu0 %v2090_v59  ;;  %1725 = vmatprep.mubr.msk.f32.mxu1 %vm1926_vm1, %v1927_v6 }
  0x6b   :  { %1604 = vmatprep.mubr.msk.f32.mxu0 %vm1926_vm1, %v1927_v6  ;;  %1739 = vmatpush3.msk.msra.mxu1 %vm40_vm8, %v1929_v51 }
  0x6d   :  { %1726 = vmatmul.mubr.f32.gmra.mrb[4].mxu1 %v2100_v1 }
  0x6e   :  { %1605 = vmatmul.mubr.f32.gmra.mrb[6].mxu0 %v2116_v14  ;;  %1728 = vmatprep.mubr.msk.f32.mxu1 %vm1926_vm1, %v1927_v6 }
  0x6f   :  { %1607 = vmatprep.mubr.msk.f32.mxu0 %vm1926_vm1, %v1927_v6 }
  0x71   :  { %1729 = vmatmul.mubr.f32.gmra.mrb[6].mxu1 %v2134_v39 }
  0x72   :  { %1608 = vmatmul.mubr.f32.gmra.mrb[8].mxu0 %v2142_v42  ;;  %1731 = vmatprep.mubr.msk.f32.mxu1 %vm1926_vm1, %v1927_v6 }
  0x73   :  { %1614 = vmatprep.mubr.msk.f32.mxu0 %vm1926_vm1, %v1927_v6 }
  0x75   :  { %1732 = vmatmul.mubr.f32.gmra.mrb[8].mxu1 %v2159_v58 }
  0x76   :  { %1615 = vmatmul.mubr.f32.vlgmr.msra.gmra.mrb[0].mxu0 %v1983_v11  ;;  %1740 = vmatprep.mubr.msk.f32.mxu1 %vm1926_vm1, %v1927_v6 }
  0x77   :  { %1617 = vmatprep.mubr.msk.f32.mxu0 %vm1926_vm1, %v1927_v6 }
  0x79   :  { %1741 = vmatmul.mubr.f32.vlgmr.msra.gmra.mrb[0].mxu1 %v1999_v20 }
  0x7a   :  { %1618 = vmatmul.mubr.f32.gmra.mrb[2].mxu0 %v2043_v36  ;;  %1743 = vmatprep.mubr.msk.f32.mxu1 %vm1926_vm1, %v1927_v6 }
  0x7b   :  { %1620 = vmatprep.mubr.msk.f32.mxu0 %vm1926_vm1, %v1927_v6 }
  0x7d   :  { %1744 = vmatmul.mubr.f32.gmra.mrb[2].mxu1 %v2081_v54 }
  0x7e   :  { %1621 = vmatmul.mubr.f32.gmra.mrb[4].mxu0 %v2090_v59  ;;  %1746 = vmatprep.mubr.msk.f32.mxu1 %vm1926_vm1, %v1927_v6 }
  0x7f   :  { %1623 = vmatprep.mubr.msk.f32.mxu0 %vm1926_vm1, %v1927_v6 }
  0x81   :  { %1747 = vmatmul.mubr.f32.gmra.mrb[4].mxu1 %v2100_v1 }
  0x82   :  { %1624 = vmatmul.mubr.f32.gmra.mrb[6].mxu0 %v2116_v14  ;;  %1749 = vmatprep.mubr.msk.f32.mxu1 %vm1926_vm1, %v1927_v6 }
  0x83   :  { %1626 = vmatprep.mubr.msk.f32.mxu0 %vm1926_vm1, %v1927_v6 }
  0x85   :  { %1750 = vmatmul.mubr.f32.gmra.mrb[6].mxu1 %v2134_v39 }
  0x86   :  { %1627 = vmatmul.mubr.f32.gmra.mrb[8].mxu0 %v2142_v42  ;;  %1752 = vmatprep.mubr.msk.f32.mxu1 %vm1926_vm1, %v1927_v6 }
  0x89   :  { %1753 = vmatmul.mubr.f32.gmra.mrb[8].mxu1 %v2159_v58 }
 0x149   :  { %v671_v0 = vpop.f32.mrb[0].mxu0 }
 0x14a   :  { %v1616_v2 = vpop.f32.mrb[1].mxu0 }
 0x14c   :  { %v1336_v11 = vpop.f32.mrb[0].mxu1 }
 0x14d   :  { %v1364_v16 = vmul.f32 %v1336_v11, %v671_v0  ;;  %v1742_v19 = vpop.f32.mrb[1].mxu1  ;;  %v677_v20 = vpop.f32.mrb[2].mxu0 }
 0x14e   :  { %v1619_v21 = vpop.f32.mrb[3].mxu0 }
 0x150   :  { %v1342_v22 = vpop.f32.mrb[2].mxu1 }
 0x151   :  { %v1365_v24 = vmul.f32 %v1342_v22, %v677_v20  ;;  %v1745_v26 = vpop.f32.mrb[3].mxu1  ;;  %v683_v27 = vpop.f32.mrb[4].mxu0 }
 0x152   :  { %v1622_v29 = vpop.f32.mrb[5].mxu0 }
 0x153   :  { %v1369_v30 = vadd.f32 %v1365_v24, %v1364_v16 }
 0x154   :  { %v1348_v32 = vpop.f32.mrb[4].mxu1 }
 0x155   :  { %v1366_v35 = vmul.f32 %v1348_v32, %v683_v27  ;;  %v1748_v36 = vpop.f32.mrb[5].mxu1  ;;  %v689_v43 = vpop.f32.mrb[6].mxu0 }
 0x156   :  { %v1625_v6 = vpop.f32.mrb[7].mxu0 }
 0x157   :  { %v1370_v44 = vadd.f32 %v1369_v30, %v1366_v35 }
 0x158   :  { %v1354_v45 = vpop.f32.mrb[6].mxu1 }
 0x159   :  { %v1367_v51 = vmul.f32 %v1354_v45, %v689_v43  ;;  %v1751_v53 = vpop.f32.mrb[7].mxu1  ;;  %v695_v54 = vpop.f32.mrb[8].mxu0 }
 0x15a   :  { %v1628_v59 = vpop.f32.mrb[9].mxu0 }
 0x15b   :  { %v1371_v63 = vadd.f32 %v1370_v44, %v1367_v51 }
 0x15c   :  { %v1360_v1 = vpop.f32.mrb[8].mxu1 }
 0x15d   :  { %v1368_v8 = vmul.f32 %v1360_v1, %v695_v54  ;;  %v1754_v12 = vpop.f32.mrb[9].mxu1 }
 0x15f   :  { %v1373_v13 = vsel %vm1372_vm10, %v1368_v8, 0.0 }
 0x160   :  { %v1374_v14 = vadd.f32 %v1373_v13, %v1371_v63 }
 0x162   :  { %v1375_v17 = vrot.slane %v1374_v14, 4 }
 0x164   :  { %v1376_v25 = vadd.f32 %v1375_v17, %v1374_v14 }
 0x166   :  { %v1377_v34 = vrot.slane %v1376_v25, 2 }
 0x168   :  { %v1378_v37 = vadd.f32 %v1377_v34, %v1376_v25 }
 0x16a   :  { %v1379_v39 = vrot.slane %v1378_v37, 1 }
 0x16c   :  { %v1380_v41 = vadd.f32 %v1379_v39, %v1378_v37 }
 0x16e   :  { %v1424_v42 = vmul.f32 -1.442695, %v1380_v41 }
 0x170   :  { %1897 = vpow2.f32 %v1424_v42 }
 0x17a   :  { %v1898_v46 = vpop.eup %1897 }
 0x17b   :  { %v1384_v47 = vadd.f32 1.0, %v1898_v46 }
 0x17d   :  { %1899 = vrcp.f32 %v1384_v47 }
 0x187   :  { %v1900_v48 = vpop.eup %1899 }
 0x188   :  { %1387 = vst [vmem:[#allocation2] sm:$0x1] %v1900_v48 }
 0x189   :  { %1912 = shalt.err (!%p1909_p4)
}
 0x18a   :  { %s1913_s15 = scalar_lea.hbm %s2417_s4, 16 }
 0x18b   :  { %p1914_p5 = scmp.ne.s32.totalorder %s2417_s4, %s1913_s15  ;;  %p1917_p6 = scmp.lt.u32.totalorder %s1913_s15, %s2417_s4 }
 0x18d   :  { %p1919_p7 = pnand %p1917_p6, %p1914_p5 }
 0x18f   :  { %1922 = shalt.err (!%p1919_p7)
}
 0x190   :  { %1397 = dma.vmem_to_hbm [thread:$0]  %s1395_s1, 16, %s2417_s4, [#allocation3]  }
 0x191   :  { %1923 = dma.done.wait [#allocation3], 16  }
 0x192   :  { %1924 = vsyncadd [#allocation3], 4294967280 }
 0x193   :  { %1401 = vsyncpa [#allocation3], 1 }

</bundles_post_ra>
